<compile_context>
chip_gen: v6e
topology: v6e:2x2x1
jax: 0.10.0
libtpu: 0.0.40
codegen_flags: <defaults>
</compile_context>

<pallas_src>
import jax
import jax.numpy as jnp
from jax import lax
from jax.experimental import pallas as pl
from jax.experimental.pallas import tpu as pltpu

_BIG = float(jnp.finfo(jnp.float32).max)


def _round_up(a, b):
    return (a + b - 1) // b * b


def _make_kernel(Nx, Ny, TNX, TNY, NI, NJ, BT):
    has_row_pad = _round_up(Nx, TNX) > Nx
    has_col_pad = _round_up(Ny, TNY) > Ny

    def kernel(x_ref, y_ref, out_ref, colmin_ref, rowmin_ref):
        i = pl.program_id(1)
        j = pl.program_id(2)

        @pl.when((i == 0) & (j == 0))
        def _init_batch_block():
            out_ref[...] = jnp.zeros((BT, 1, 1), jnp.float32)
            colmin_ref[...] = jnp.full((NJ, BT, 1, TNY), _BIG, jnp.float32)

        @pl.when(j == 0)
        def _init_i_tile():
            rowmin_ref[...] = jnp.full((BT, TNX, 1), _BIG, jnp.float32)

        x = x_ref[...].astype(jnp.float32)            # (BT, TNX, D)  gts
        y = y_ref[...].astype(jnp.float32)            # (BT, TNY, D)  preds

        xx = jnp.sum(x * x, axis=2, keepdims=True)    # (BT, TNX, 1)
        yy = jnp.sum(y * y, axis=2)[:, None, :]       # (BT, 1, TNY)
        # Contract last dims directly -> no materialized transpose; MXU path.
        zz = jnp.einsum("bid,bjd->bij", x, y,
                        preferred_element_type=jnp.float32)   # (BT, TNX, TNY)
        P = xx + yy - 2.0 * zz

        # Penalize padded rows / columns so they never win a min
        # (cheap broadcast-adds along the same axes as xx / yy).
        if has_row_pad:
            row_ids = i * TNX + lax.broadcasted_iota(jnp.int32, (1, TNX, 1), 1)
            P = P + jnp.where(row_ids < Nx, 0.0, _BIG)
        if has_col_pad:
            col_ids = j * TNY + lax.broadcasted_iota(jnp.int32, (1, 1, TNY), 2)
            P = P + jnp.where(col_ids < Ny, 0.0, _BIG)

        # running min over y-points (axis 2) for this i tile, carried across j
        tile_rowmin = jnp.min(P, axis=2, keepdims=True)        # (BT, TNX, 1)
        new_rowmin = jnp.minimum(rowmin_ref[...], tile_rowmin)
        rowmin_ref[...] = new_rowmin

        # running min over x-points (axis 1) for this j tile, carried across i
        tile_colmin = jnp.min(P, axis=1, keepdims=True)        # (BT, 1, TNY)
        new_colmin = jnp.minimum(colmin_ref[j], tile_colmin)
        colmin_ref[j] = new_colmin

        @pl.when(j == NJ - 1)
        def _finalize_rows():                                  # min over all y done
            rm = new_rowmin
            if has_row_pad:
                row_ids = i * TNX + lax.broadcasted_iota(jnp.int32, (1, TNX, 1), 1)
                rm = jnp.where(row_ids < Nx, rm, 0.0)
            out_ref[...] += jnp.sum(rm, axis=1, keepdims=True)  # (BT, 1, 1)

        @pl.when(i == NI - 1)
        def _finalize_cols():                                  # min over all x done
            cm = new_colmin
            if has_col_pad:
                col_ids = j * TNY + lax.broadcasted_iota(jnp.int32, (1, 1, TNY), 2)
                cm = jnp.where(col_ids < Ny, cm, 0.0)
            out_ref[...] += jnp.sum(cm, axis=2, keepdims=True)  # (BT, 1, 1)

    return kernel


def chamfer_loss(preds, gts):
    """preds: (B, Ny, D), gts: (B, Nx, D) -> scalar float32 loss."""
    B, Nx, D = gts.shape
    Bp, Ny, Dp = preds.shape
    assert B == Bp and D == Dp

    # Batch tile: single step when B is small, else multiples of 8 (output
    # block sublane constraint); padded batch elements contribute exactly 0.
    if B <= 8:
        BT, B_pad = B, B
    else:
        BT = 8
        B_pad = _round_up(B, BT)

    # Point tiles: lane dim (Ny) multiple of 128, sublane dim (Nx) multiple of
    # 8; shrink TNX so the per-step P tile stays <= ~4 MiB of f32 (safe within
    # the 64 MiB physical VMEM of v7x as well as v5e/v6e).
    TNY = min(_round_up(Ny, 128), 1024)
    TNX = min(_round_up(Nx, 8), 512)
    while BT * TNX * TNY * 4 > (4 << 20) and TNX > 8:
        TNX = max(8, _round_up(TNX // 2, 8))
    Nx_pad = _round_up(Nx, TNX)
    Ny_pad = _round_up(Ny, TNY)
    NI = Nx_pad // TNX
    NJ = Ny_pad // TNY
    NB = B_pad // BT

    def pad3(a, b_pad, n_pad):
        b, n, _ = a.shape
        if b == b_pad and n == n_pad:
            return a
        return jnp.pad(a, ((0, b_pad - b), (0, n_pad - n), (0, 0)))

    gts_p = pad3(gts, B_pad, Nx_pad)
    preds_p = pad3(preds, B_pad, Ny_pad)

    kernel = _make_kernel(Nx, Ny, TNX, TNY, NI, NJ, BT)

    out = pl.pallas_call(
        kernel,
        out_shape=jax.ShapeDtypeStruct((B_pad, 1, 1), jnp.float32),
        grid_spec=pltpu.PrefetchScalarGridSpec(
            num_scalar_prefetch=0,
            grid=(NB, NI, NJ),
            in_specs=[
                pl.BlockSpec((BT, TNX, D), lambda b, i, j: (b, i, 0)),   # gts  (x)
                pl.BlockSpec((BT, TNY, D), lambda b, i, j: (b, j, 0)),   # preds (y)
            ],
            out_specs=pl.BlockSpec((BT, 1, 1), lambda b, i, j: (b, 0, 0)),
            scratch_shapes=[
                # running min over i: one (BT, 1, TNY) slab per j tile
                # (for extremely large Ny the 1-sublane padding of these slabs
                #  becomes the VMEM limiter; repack if that regime matters)
                pltpu.VMEM((NJ, BT, 1, TNY), jnp.float32),
                # running min over j for the current i tile
                pltpu.VMEM((BT, TNX, 1), jnp.float32),
            ],
        ),
        compiler_params=pltpu.CompilerParams(
            dimension_semantics=("parallel", "arbitrary", "arbitrary"),
            vmem_limit_bytes=32 * 1024 * 1024,
        ),
    )(gts_p, preds_p)

    return jnp.sum(out[:B, 0, 0])


def _chamfer_loss_ref(preds, gts):
    """Pure-JAX reference mirroring the PyTorch module exactly."""
    x, y = gts.astype(jnp.float32), preds.astype(jnp.float32)
    xx = jnp.sum(x * x, axis=-1)                       # (B, Nx)
    yy = jnp.sum(y * y, axis=-1)                       # (B, Ny)
    zz = jnp.einsum("bid,bjd->bij", x, y)              # (B, Nx, Ny)
    P = xx[:, :, None] + yy[:, None, :] - 2.0 * zz
    return jnp.sum(jnp.min(P, axis=1)) + jnp.sum(jnp.min(P, axis=2))


if __name__ == "__main__":
    key = jax.random.PRNGKey(0)
    k1, k2, k3, k4 = jax.random.split(key, 4)

    # Small case (single grid step, lane-padded Ny): gts (B, Nx, D), preds (B, Ny, D).
    B, Nx, Ny, D = 2, 64, 48, 3
    gts = jax.random.normal(k1, (B, Nx, D), dtype=jnp.float32)
    preds = jax.random.normal(k2, (B, Ny, D), dtype=jnp.float32)
    loss = jax.block_until_ready(chamfer_loss(preds, gts))
    ref = jax.block_until_ready(_chamfer_loss_ref(preds, gts))
    assert jnp.allclose(loss, ref, rtol=1e-4, atol=1e-3), (loss, ref)

    # Larger case exercising the tiled running-min path (multiple batch,
    # i-tile and j-tile grid steps plus row/col/batch padding).
    B2, Nx2, Ny2 = 10, 300, 1300
    gts2 = jax.random.normal(k3, (B2, Nx2, D), dtype=jnp.float32)
    preds2 = jax.random.normal(k4, (B2, Ny2, D), dtype=jnp.float32)
    loss2 = jax.block_until_ready(chamfer_loss(preds2, gts2))
    ref2 = jax.block_until_ready(_chamfer_loss_ref(preds2, gts2))
    assert jnp.allclose(loss2, ref2, rtol=1e-4, atol=1e-3), (loss2, ref2)

    print("KERNEL_OK")
</pallas_src>

<mosaic_0001>
module attributes {stable_mosaic.version = 11 : i64} {
  func.func @kernel(%arg0: i32, %arg1: i32, %arg2: i32, %arg3: memref<2x64x3xf32, #tpu.memory_space<vmem>>, %arg4: memref<2x128x3xf32, #tpu.memory_space<vmem>>, %arg5: memref<2x1x1xf32, #tpu.memory_space<vmem>>, %arg6: memref<1x2x1x128xf32, #tpu.memory_space<vmem>>, %arg7: memref<2x64x1xf32, #tpu.memory_space<vmem>>) attributes {dimension_semantics = [#tpu.dimension_semantics<parallel>, #tpu.dimension_semantics<arbitrary>, #tpu.dimension_semantics<arbitrary>], iteration_bounds = array<i64: 1, 1, 1>, scalar_prefetch = 0 : i64, scratch_operands = 2 : i64, tpu.core_type = #tpu.core_type<tc>, window_params = [{transform_indices = @transform_0, window_bounds = array<i64: 2, 64, 3>}, {transform_indices = @transform_1, window_bounds = array<i64: 2, 128, 3>}, {transform_indices = @transform_2, window_bounds = array<i64: 2, 1, 1>}]} {
    %c0_i32 = arith.constant 0 : i32
    %0 = arith.cmpi eq, %arg1, %c0_i32 : i32
    %c0_i32_0 = arith.constant 0 : i32
    %1 = arith.cmpi eq, %arg2, %c0_i32_0 : i32
    %2 = arith.andi %0, %1 : i1
    %3 = arith.extui %2 : i1 to i32
    %c0_i32_1 = arith.constant 0 : i32
    %4 = arith.cmpi ne, %3, %c0_i32_1 : i32
    scf.if %4 {
      %cst_32 = arith.constant 0.000000e+00 : f32
      %55 = vector.broadcast %cst_32 : f32 to vector<2x1x1xf32>
      %c0_33 = arith.constant 0 : index
      %c0_34 = arith.constant 0 : index
      %c0_35 = arith.constant 0 : index
      %56 = vector.load %arg5[%c0_33, %c0_34, %c0_35] : memref<2x1x1xf32, #tpu.memory_space<vmem>>, vector<2x1x1xf32>
      tpu.vector_store %arg5[%c0_33, %c0_34, %c0_35], %55 {strides = array<i32>} : memref<2x1x1xf32, #tpu.memory_space<vmem>>, vector<2x1x1xf32>,
      %cst_36 = arith.constant 3.40282347E+38 : f32
      %57 = vector.broadcast %cst_36 : f32 to vector<1x2x1x128xf32>
      %c0_37 = arith.constant 0 : index
      %c0_38 = arith.constant 0 : index
      %c0_39 = arith.constant 0 : index
      %c0_40 = arith.constant 0 : index
      %58 = vector.load %arg6[%c0_37, %c0_38, %c0_39, %c0_40] : memref<1x2x1x128xf32, #tpu.memory_space<vmem>>, vector<1x2x1x128xf32>
      tpu.vector_store %arg6[%c0_37, %c0_38, %c0_39, %c0_40], %57 {strides = array<i32>} : memref<1x2x1x128xf32, #tpu.memory_space<vmem>>, vector<1x2x1x128xf32>,
    } else {
    }
    %c0_i32_2 = arith.constant 0 : i32
    %5 = arith.cmpi eq, %arg2, %c0_i32_2 : i32
    %6 = arith.extui %5 : i1 to i32
    %c0_i32_3 = arith.constant 0 : i32
    %7 = arith.cmpi ne, %6, %c0_i32_3 : i32
    scf.if %7 {
      %cst_32 = arith.constant 3.40282347E+38 : f32
      %55 = vector.broadcast %cst_32 : f32 to vector<2x64x1xf32>
      %c0_33 = arith.constant 0 : index
      %c0_34 = arith.constant 0 : index
      %c0_35 = arith.constant 0 : index
      %56 = vector.load %arg7[%c0_33, %c0_34, %c0_35] : memref<2x64x1xf32, #tpu.memory_space<vmem>>, vector<2x64x1xf32>
      tpu.vector_store %arg7[%c0_33, %c0_34, %c0_35], %55 {strides = array<i32>} : memref<2x64x1xf32, #tpu.memory_space<vmem>>, vector<2x64x1xf32>,
    } else {
    }
    %c0 = arith.constant 0 : index
    %c0_4 = arith.constant 0 : index
    %c0_5 = arith.constant 0 : index
    %8 = vector.load %arg3[%c0, %c0_4, %c0_5] : memref<2x64x3xf32, #tpu.memory_space<vmem>>, vector<2x64x3xf32>
    %c0_6 = arith.constant 0 : index
    %c0_7 = arith.constant 0 : index
    %c0_8 = arith.constant 0 : index
    %9 = vector.load %arg4[%c0_6, %c0_7, %c0_8] : memref<2x128x3xf32, #tpu.memory_space<vmem>>, vector<2x128x3xf32>
    %10 = arith.mulf %8, %8 : vector<2x64x3xf32>
    %cst = arith.constant dense<0.000000e+00> : vector<2x64xf32>
    %11 = vector.multi_reduction <add>, %10, %cst [2] : vector<2x64x3xf32> to vector<2x64xf32>
    %12 = vector.shape_cast %11 : vector<2x64xf32> to vector<2x64x1xf32>
    %13 = arith.mulf %9, %9 : vector<2x128x3xf32>
    %cst_9 = arith.constant dense<0.000000e+00> : vector<2x128xf32>
    %14 = vector.multi_reduction <add>, %13, %cst_9 [2] : vector<2x128x3xf32> to vector<2x128xf32>
    %15 = vector.shape_cast %14 : vector<2x128xf32> to vector<2x1x128xf32>
    "tpu.trace_start"() <{level = 10 : i32, message = "bid,bjd->bij"}> : () -> ()
    %cst_10 = arith.constant dense<0.000000e+00> : vector<2x64x128xf32>
    %16 = tpu.matmul %8, %9, %cst_10 {dimension_numbers = #tpu.dot_dimension_numbers<[2], [2], [1], [1], [0, 0, 0, 1, 1, 1], [0], [0]>} : vector<2x64x3xf32>, vector<2x128x3xf32>, vector<2x64x128xf32> -> vector<2x64x128xf32>
    "tpu.trace_stop"() : () -> ()
    %17 = vector.broadcast %12 : vector<2x64x1xf32> to vector<2x64x128xf32>
    %18 = vector.broadcast %15 : vector<2x1x128xf32> to vector<2x64x128xf32>
    %19 = arith.addf %17, %18 : vector<2x64x128xf32>
    %cst_11 = arith.constant 2.000000e+00 : f32
    %20 = vector.broadcast %cst_11 : f32 to vector<2x64x128xf32>
    %21 = arith.mulf %20, %16 : vector<2x64x128xf32>
    %22 = arith.subf %19, %21 : vector<2x64x128xf32>
    %c128_i32 = arith.constant 128 : i32
    %23 = arith.muli %arg2, %c128_i32 : i32
    %24 = tpu.iota {dimensions = array<i32: 2>} : vector<1x1x128xi32>
    %25 = vector.broadcast %23 : i32 to vector<1x1x128xi32>
    %26 = arith.addi %25, %24 : vector<1x1x128xi32>
    %c48_i32 = arith.constant 48 : i32
    %27 = vector.broadcast %c48_i32 : i32 to vector<1x1x128xi32>
    %28 = arith.cmpi slt, %26, %27 : vector<1x1x128xi32>
    %cst_12 = arith.constant 0.000000e+00 : f32
    %cst_13 = arith.constant 3.40282347E+38 : f32
    %29 = vector.broadcast %cst_12 : f32 to vector<1x1x128xf32>
    %30 = vector.broadcast %cst_13 : f32 to vector<1x1x128xf32>
    %31 = arith.select %28, %29, %30 : vector<1x1x128xi1>, vector<1x1x128xf32>
    %32 = vector.broadcast %31 : vector<1x1x128xf32> to vector<2x64x128xf32>
    %33 = arith.addf %22, %32 : vector<2x64x128xf32>
    %cst_14 = arith.constant dense<0x7F800000> : vector<2x64xf32>
    %34 = vector.multi_reduction <minimumf>, %33, %cst_14 [2] : vector<2x64x128xf32> to vector<2x64xf32>
    %35 = vector.shape_cast %34 : vector<2x64xf32> to vector<2x64x1xf32>
    %c0_15 = arith.constant 0 : index
    %c0_16 = arith.constant 0 : index
    %c0_17 = arith.constant 0 : index
    %36 = vector.load %arg7[%c0_15, %c0_16, %c0_17] : memref<2x64x1xf32, #tpu.memory_space<vmem>>, vector<2x64x1xf32>
    %37 = arith.minimumf %36, %35 : vector<2x64x1xf32>
    %c0_18 = arith.constant 0 : index
    %c0_19 = arith.constant 0 : index
    %c0_20 = arith.constant 0 : index
    %38 = vector.load %arg7[%c0_18, %c0_19, %c0_20] : memref<2x64x1xf32, #tpu.memory_space<vmem>>, vector<2x64x1xf32>
    tpu.vector_store %arg7[%c0_18, %c0_19, %c0_20], %37 {strides = array<i32>} : memref<2x64x1xf32, #tpu.memory_space<vmem>>, vector<2x64x1xf32>,
    %cst_21 = arith.constant dense<0x7F800000> : vector<2x128xf32>
    %39 = vector.multi_reduction <minimumf>, %33, %cst_21 [1] : vector<2x64x128xf32> to vector<2x128xf32>
    %40 = vector.shape_cast %39 : vector<2x128xf32> to vector<2x1x128xf32>
    %41 = arith.index_cast %arg2 : i32 to index
    %c0_22 = arith.constant 0 : index
    %c0_23 = arith.constant 0 : index
    %c0_24 = arith.constant 0 : index
    %42 = vector.load %arg6[%41, %c0_22, %c0_23, %c0_24] : memref<1x2x1x128xf32, #tpu.memory_space<vmem>>, vector<1x2x1x128xf32>
    %43 = vector.shape_cast %42 : vector<1x2x1x128xf32> to vector<2x1x128xf32>
    %44 = arith.minimumf %43, %40 : vector<2x1x128xf32>
    %45 = arith.index_cast %arg2 : i32 to index
    %c0_25 = arith.constant 0 : index
    %c0_26 = arith.constant 0 : index
    %c0_27 = arith.constant 0 : index
    %46 = vector.load %arg6[%45, %c0_25, %c0_26, %c0_27] : memref<1x2x1x128xf32, #tpu.memory_space<vmem>>, vector<1x2x1x128xf32>
    %47 = vector.shape_cast %46 : vector<1x2x1x128xf32> to vector<2x1x128xf32>
    %48 = vector.shape_cast %44 : vector<2x1x128xf32> to vector<1x2x1x128xf32>
    tpu.vector_store %arg6[%45, %c0_25, %c0_26, %c0_27], %48 {strides = array<i32>} : memref<1x2x1x128xf32, #tpu.memory_space<vmem>>, vector<1x2x1x128xf32>,
    %c0_i32_28 = arith.constant 0 : i32
    %49 = arith.cmpi eq, %arg2, %c0_i32_28 : i32
    %50 = arith.extui %49 : i1 to i32
    %c0_i32_29 = arith.constant 0 : i32
    %51 = arith.cmpi ne, %50, %c0_i32_29 : i32
    scf.if %51 {
      %c0_32 = arith.constant 0 : index
      %c0_33 = arith.constant 0 : index
      %c0_34 = arith.constant 0 : index
      %55 = vector.load %arg5[%c0_32, %c0_33, %c0_34] : memref<2x1x1xf32, #tpu.memory_space<vmem>>, vector<2x1x1xf32>
      %cst_35 = arith.constant dense<0.000000e+00> : vector<2x1xf32>
      %56 = vector.multi_reduction <add>, %37, %cst_35 [1] : vector<2x64x1xf32> to vector<2x1xf32>
      %57 = vector.shape_cast %56 : vector<2x1xf32> to vector<2x1x1xf32>
      %58 = arith.addf %55, %57 : vector<2x1x1xf32>
      %c0_36 = arith.constant 0 : index
      %c0_37 = arith.constant 0 : index
      %c0_38 = arith.constant 0 : index
      %59 = vector.load %arg5[%c0_36, %c0_37, %c0_38] : memref<2x1x1xf32, #tpu.memory_space<vmem>>, vector<2x1x1xf32>
      tpu.vector_store %arg5[%c0_36, %c0_37, %c0_38], %58 {strides = array<i32>} : memref<2x1x1xf32, #tpu.memory_space<vmem>>, vector<2x1x1xf32>,
    } else {
    }
    %c0_i32_30 = arith.constant 0 : i32
    %52 = arith.cmpi eq, %arg1, %c0_i32_30 : i32
    %53 = arith.extui %52 : i1 to i32
    %c0_i32_31 = arith.constant 0 : i32
    %54 = arith.cmpi ne, %53, %c0_i32_31 : i32
    scf.if %54 {
      %c128_i32_32 = arith.constant 128 : i32
      %55 = arith.muli %arg2, %c128_i32_32 : i32
      %56 = tpu.iota {dimensions = array<i32: 2>} : vector<1x1x128xi32>
      %57 = vector.broadcast %55 : i32 to vector<1x1x128xi32>
      %58 = arith.addi %57, %56 : vector<1x1x128xi32>
      %c48_i32_33 = arith.constant 48 : i32
      %59 = vector.broadcast %c48_i32_33 : i32 to vector<1x1x128xi32>
      %60 = arith.cmpi slt, %58, %59 : vector<1x1x128xi32>
      %cst_34 = arith.constant 0.000000e+00 : f32
      %61 = vector.shape_cast %60 : vector<1x1x128xi1> to vector<1x1x128xi1>
      %62 = vector.broadcast %61 : vector<1x1x128xi1> to vector<2x1x128xi1>
      %63 = vector.broadcast %cst_34 : f32 to vector<2x1x128xf32>
      %64 = arith.select %62, %44, %63 : vector<2x1x128xi1>, vector<2x1x128xf32>
      %c0_35 = arith.constant 0 : index
      %c0_36 = arith.constant 0 : index
      %c0_37 = arith.constant 0 : index
      %65 = vector.load %arg5[%c0_35, %c0_36, %c0_37] : memref<2x1x1xf32, #tpu.memory_space<vmem>>, vector<2x1x1xf32>
      %cst_38 = arith.constant dense<0.000000e+00> : vector<2x1xf32>
      %66 = vector.multi_reduction <add>, %64, %cst_38 [2] : vector<2x1x128xf32> to vector<2x1xf32>
      %67 = vector.shape_cast %66 : vector<2x1xf32> to vector<2x1x1xf32>
      %68 = arith.addf %65, %67 : vector<2x1x1xf32>
      %c0_39 = arith.constant 0 : index
      %c0_40 = arith.constant 0 : index
      %c0_41 = arith.constant 0 : index
      %69 = vector.load %arg5[%c0_39, %c0_40, %c0_41] : memref<2x1x1xf32, #tpu.memory_space<vmem>>, vector<2x1x1xf32>
      tpu.vector_store %arg5[%c0_39, %c0_40, %c0_41], %68 {strides = array<i32>} : memref<2x1x1xf32, #tpu.memory_space<vmem>>, vector<2x1x1xf32>,
    } else {
    }
    return
  }
  func.func @transform_0(%arg0: i32, %arg1: i32, %arg2: i32) -> (i32, i32, i32) {
    %c0_i32 = arith.constant 0 : i32
    %c0_i32_0 = arith.constant 0 : i32
    return %arg0, %arg1, %c0_i32 : i32, i32, i32
  }
  func.func @transform_1(%arg0: i32, %arg1: i32, %arg2: i32) -> (i32, i32, i32) {
    %c0_i32 = arith.constant 0 : i32
    %c0_i32_0 = arith.constant 0 : i32
    return %arg0, %arg2, %c0_i32 : i32, i32, i32
  }
  func.func @transform_2(%arg0: i32, %arg1: i32, %arg2: i32) -> (i32, i32, i32) {
    %c0_i32 = arith.constant 0 : i32
    %c0_i32_0 = arith.constant 0 : i32
    %c0_i32_1 = arith.constant 0 : i32
    return %arg0, %c0_i32, %c0_i32_0 : i32, i32, i32
  }
}

</mosaic_0001>

<bundles_post_ra>
// kernel: tpu_custom_call.1
= control target key start
LH: loop header
LB: loop body
LE: loop exit
PB: predicated region body
PF: predicated region fallthrough
CT: control target
= control target key end

     0   :  { %vm106_vm0 = vcmask 23552   ;;  %vm25_vm1 = vcmask 7168   ;;  %vm680_vm2 = vcmask 130112   ;;  %vm687_vm3 = vcmask 195712   ;;  %s2042_s1 = inlined_call_operand.vmem [shape: f32[2,128,3], index: 1, kind: input, shape index: {}]   ;;  %s2043_s0 = inlined_call_operand.vmem [shape: f32[2,64,3], index: 0, kind: input, shape index: {}]   ;;  %s2044_s2 = inlined_call_operand.vmem [shape: f32[2,1,1], index: 2, kind: output, shape index: {}]  }
   0x1   :  { %v1346_v0 = vld [vmem:[%s2042_s1 + $0x78] sm:$0xff]  ;;  %v1356_v2 = vld [vmem:[%s2042_s1 + $0x80] sm:$0xff]  ;;  %v1372_v5 = vld [vmem:[%s2042_s1 + $0x70] sm:$0xff]  ;;  %vm694_vm4 = vcmask 261312   ;;  %vm701_vm5 = vcmask 326912   ;;  %vm708_vm6 = vcmask 392512  }
   0x2   :  { %v1351_v1 = vld [vmem:[%s2042_s1 + $0xf8] sm:$0xff]  ;;  %1236 = vmatprep.subr.msk.mxu0 %vm106_vm0, %v1346_v0  ;;  %v171_v3 = vmul.f32 %v1356_v2, %v1356_v2  ;;  %v1367_v4 = vld [vmem:[%s2042_s1] sm:$0xff]  ;;  %v1377_v6 = vld [vmem:[%s2042_s1 + $0xf0] sm:$0xff]  ;;  %vm715_vm7 = vcmask 458112   ;;  %vm722_vm8 = vcmask 523712   ;;  %vm729_vm9 = vcmask 589312  }
   0x3   :  { %1280 = vmatprep.subr.msk.mxu1 %vm106_vm0, %v1351_v1  ;;  %1237 = vmatpush3.xpose.msk.msra.mxu0 %vm106_vm0, %v1346_v0  ;;  %v155_v7 = vmul.f32 %v1367_v4, %v1367_v4  ;;  %v1388_v8 = vld [vmem:[%s2042_s1 + $0x88] sm:$0xff]  ;;  %v1407_v13 = vld [vmem:[%s2042_s1 + $0x90] sm:$0xff]  ;;  %v1438_v22 = vld [vmem:[%s2042_s1 + $0x98] sm:$0xff]  ;;  %vm736_vm10 = vcmask 654912   ;;  %vm743_vm11 = vcmask 720512   ;;  %vm750_vm12 = vcmask 786112  }
   0x4   :  { %1281 = vmatpush3.xpose.msk.msra.mxu1 %vm106_vm0, %v1351_v1  ;;  %v1393_v9 = vld [vmem:[%s2042_s1 + $0x8] sm:$0xff]  ;;  %v235_v10 = vsel %vm106_vm0, %v171_v3, 0.0  ;;  %1238 = vmatprep.subr.msk.mxu0 %vm106_vm0, %v1372_v5  ;;  %v172_v11 = vmul.f32 %v1388_v8, %v1388_v8  ;;  %v1412_v14 = vld [vmem:[%s2042_s1 + $0x10] sm:$0xff]  ;;  %v173_v19 = vmul.f32 %v1407_v13, %v1407_v13  ;;  %v1447_v23 = vld [vmem:[%s2042_s1 + $0x18] sm:$0xff]  ;;  %v174_v27 = vmul.f32 %v1438_v22, %v1438_v22 }
   0x5   :  { %1282 = vmatprep.subr.msk.mxu1 %vm106_vm0, %v1377_v6  ;;  %v156_v12 = vmul.f32 %v1393_v9, %v1393_v9  ;;  %236 = vadd.xlane.f32.xlu1 %v235_v10  ;;  %v187_v15 = vsel %vm106_vm0, %v155_v7, 0.0  ;;  %v1418_v16 = vld [vmem:[%s2042_s1 + $0x68] sm:$0xff]  ;;  %v157_v21 = vmul.f32 %v1412_v14, %v1412_v14  ;;  %v1452_v24 = vld [vmem:[%s2042_s1 + $0x60] sm:$0xff]  ;;  %v158_v29 = vmul.f32 %v1447_v23, %v1447_v23  ;;  %v1496_v34 = vld [vmem:[%s2042_s1 + $0x58] sm:$0xff] }
   0x6   :  { %v1423_v17 = vld [vmem:[%s2042_s1 + $0xe8] sm:$0xff]  ;;  %188 = vadd.xlane.f32.xlu0 %v187_v15  ;;  %v238_v18 = vsel %vm106_vm0, %v172_v11, 0.0  ;;  %v1457_v25 = vld [vmem:[%s2042_s1 + $0xe0] sm:$0xff]  ;;  %v241_v26 = vsel %vm106_vm0, %v173_v19, 0.0  ;;  %v1501_v35 = vld [vmem:[%s2042_s1 + $0xd8] sm:$0xff]  ;;  %v244_v36 = vsel %vm106_vm0, %v174_v27, 0.0 }
   0x7   :  { %1239 = vmatpush3.xpose.msk.msra.mxu0 %vm106_vm0, %v1372_v5  ;;  %v190_v20 = vsel %vm106_vm0, %v156_v12, 0.0  ;;  %v193_v28 = vsel %vm106_vm0, %v157_v21, 0.0  ;;  %v1472_v30 = vld [vmem:[%s2042_s1 + $0xa0] sm:$0xff]  ;;  %v196_v38 = vsel %vm106_vm0, %v158_v29, 0.0  ;;  %v1520_v40 = vld [vmem:[%s2042_s1 + $0xa8] sm:$0xff]  ;;  %v1534_v42 = vld [vmem:[%s2042_s1 + $0x50] sm:$0xff]  ;;  %v182_v29 = vmul.f32 %v1501_v35, %v1501_v35 }
   0x8   :  { %1283 = vmatpush3.xpose.msk.msra.mxu1 %vm106_vm0, %v1377_v6  ;;  %1240 = vmatprep.subr.msk.mxu0 %vm106_vm0, %v1418_v16  ;;  %v1477_v31 = vld [vmem:[%s2043_s0] sm:$0xff]  ;;  %v175_v37 = vmul.f32 %v1472_v30, %v1472_v30  ;;  %v1529_v41 = vld [vmem:[%s2042_s1 + $0x28] sm:$0xff]  ;;  %v84_v43 = vld [vmem:[%s2042_s1 + $0xd0] sm:$0xff]  ;;  %v176_v45 = vmul.f32 %v1520_v40, %v1520_v40  ;;  %v165_v27 = vmul.f32 %v1534_v42, %v1534_v42  ;;  %vm757_vm13 = vcmask 851712  }
   0x9   :  { %1284 = vmatprep.subr.msk.mxu1 %vm106_vm0, %v1423_v17  ;;  %239 = vadd.xlane.f32.xlu1 %v238_v18  ;;  %v1486_v32 = vld [vmem:[%s2042_s1 + $0x20] sm:$0xff]  ;;  %v160_v47 = vmul.f32 %v1529_v41, %v1529_v41  ;;  %v80_v48 = vld [vmem:[%s2042_s1 + $0xb0] sm:$0xff]  ;;  %v67_v50 = vld [vmem:[%s2042_s1 + $0x48] sm:$0xff]  ;;  %v181_v21 = vmul.f32 %v84_v43, %v84_v43  ;;  %vm764_vm14 = vcmask 917312   ;;  %vm771_vm15 = vcmask 982912  }
   0xa   :  { %191 = vadd.xlane.f32.xlu0 %v190_v20  ;;  %v1491_v33 = vld [vmem:[%s2043_s0 + $0x40] sm:$0xff]  ;;  %1268 = vmatprep.mubr.msk.f32.mxu0 %vm106_vm0, %v1477_v31  ;;  %v159_v39 = vmul.f32 %v1486_v32, %v1486_v32  ;;  %v247_v44 = vsel %vm106_vm0, %v175_v37, 0.0  ;;  %v64_v49 = vld [vmem:[%s2042_s1 + $0x30] sm:$0xff]  ;;  %v83_v51 = vld [vmem:[%s2042_s1 + $0xc8] sm:$0xff]  ;;  %v250_v52 = vsel %vm106_vm0, %v176_v45, 0.0  ;;  %v177_v53 = vmul.f32 %v80_v48, %v80_v48 }
   0xb   :  { %1241 = vmatpush3.xpose.msk.msra.mxu0 %vm106_vm0, %v1418_v16  ;;  %1312 = vmatprep.mubr.msk.f32.mxu1 %vm106_vm0, %v1491_v33  ;;  %v202_v54 = vsel %vm106_vm0, %v160_v47, 0.0  ;;  %v161_v55 = vmul.f32 %v64_v49, %v64_v49  ;;  %v81_v56 = vld [vmem:[%s2042_s1 + $0xb8] sm:$0xff]  ;;  %v66_v58 = vld [vmem:[%s2042_s1 + $0x40] sm:$0xff]  ;;  %v180_v15 = vmul.f32 %v83_v51, %v83_v51  ;;  %v164_v19 = vmul.f32 %v67_v50, %v67_v50 }
   0xc   :  { %1285 = vmatpush3.xpose.msk.msra.mxu1 %vm106_vm0, %v1423_v17  ;;  %1242 = vmatprep.subr.msk.mxu0 %vm106_vm0, %v1452_v24  ;;  %v199_v46 = vsel %vm106_vm0, %v159_v39, 0.0  ;;  %v65_v57 = vld [vmem:[%s2042_s1 + $0x38] sm:$0xff]  ;;  %v82_v59 = vld [vmem:[%s2042_s1 + $0xc0] sm:$0xff]  ;;  %v253_v60 = vsel %vm106_vm0, %v177_v53, 0.0  ;;  %v178_v61 = vmul.f32 %v81_v56, %v81_v56  ;;  %v163_v11 = vmul.f32 %v66_v58, %v66_v58  ;;  %v55_v53 = vld [vmem:[%s2043_s0 + $0x68] sm:$0xff] }
   0xd   :  { %1286 = vmatprep.subr.msk.mxu1 %vm106_vm0, %v1457_v25  ;;  %242 = vadd.xlane.f32.xlu1 %v241_v26  ;;  %v205_v62 = vsel %vm106_vm0, %v161_v55, 0.0  ;;  %v162_v63 = vmul.f32 %v65_v57, %v65_v57  ;;  %v179_v7 = vmul.f32 %v82_v59, %v82_v59  ;;  %v262_v20 = vsel %vm106_vm0, %v180_v15, 0.0  ;;  %v45_v45 = vld [vmem:[%s2043_s0 + $0x18] sm:$0xff]  ;;  %v54_v47 = vld [vmem:[%s2043_s0 + $0x60] sm:$0xff]  ;;  %v56_v55 = vld [vmem:[%s2043_s0 + $0x70] sm:$0xff] }
   0xe   :  { %194 = vadd.xlane.f32.xlu0 %v193_v28  ;;  %v256_v3 = vsel %vm106_vm0, %v178_v61, 0.0  ;;  %v211_v18 = vsel %vm106_vm0, %v163_v11, 0.0  ;;  %v214_v26 = vsel %vm106_vm0, %v164_v19, 0.0  ;;  %v265_v28 = vsel %vm106_vm0, %v181_v21, 0.0  ;;  %v57_v61 = vld [vmem:[%s2043_s0 + $0x78] sm:$0xff] }
   0xf   :  { %1243 = vmatpush3.xpose.msk.msra.mxu0 %vm106_vm0, %v1452_v24  ;;  %v208_v10 = vsel %vm106_vm0, %v162_v63, 0.0  ;;  %v259_v12 = vsel %vm106_vm0, %v179_v7, 0.0  ;;  %v166_v37 = vmul.f32 %v1496_v34, %v1496_v34  ;;  %v167_v39 = vmul.f32 %v1452_v24, %v1452_v24 }
  0x10   :  { %1287 = vmatpush3.xpose.msk.msra.mxu1 %vm106_vm0, %v1457_v25  ;;  %1244 = vmatprep.subr.msk.mxu0 %vm106_vm0, %v1496_v34  ;;  %v102_v63 = vmul.f32 %v54_v47, %v54_v47  ;;  %v103_v11 = vmul.f32 %v55_v53, %v55_v53  ;;  %v104_v19 = vmul.f32 %v56_v55, %v56_v55 }
  0x11   :  { %1288 = vmatprep.subr.msk.mxu1 %vm106_vm0, %v1501_v35  ;;  %245 = vadd.xlane.f32.xlu1 %v244_v36  ;;  %v217_v36 = vsel %vm106_vm0, %v165_v27, 0.0  ;;  %v223_v24 = vsel %vm106_vm0, %v167_v39, 0.0  ;;  %v105_v27 = vmul.f32 %v57_v61, %v57_v61 }
  0x12   :  { %197 = vadd.xlane.f32.xlu0 %v196_v38  ;;  %v183_v38 = vmul.f32 %v1457_v25, %v1457_v25 }
  0x13   :  { %1245 = vmatpush3.xpose.msk.msra.mxu0 %vm106_vm0, %v1496_v34  ;;  %v220_v34 = vsel %vm106_vm0, %v166_v37, 0.0 }
  0x14   :  { %1289 = vmatpush3.xpose.msk.msra.mxu1 %vm106_vm0, %v1501_v35  ;;  %1246 = vmatprep.subr.msk.mxu0 %vm106_vm0, %v1534_v42  ;;  %v268_v35 = vsel %vm106_vm0, %v182_v29, 0.0  ;;  %v271_v25 = vsel %vm106_vm0, %v183_v38, 0.0 }
  0x15   :  { %1290 = vmatprep.subr.msk.mxu1 %vm106_vm0, %v84_v43  ;;  %248 = vadd.xlane.f32.xlu1 %v247_v44 }
  0x16   :  { %200 = vadd.xlane.f32.xlu0 %v199_v46  ;;  %v53_v46 = vld [vmem:[%s2043_s0 + $0x58] sm:$0xff] }
  0x17   :  { %1247 = vmatpush3.xpose.msk.msra.mxu0 %vm106_vm0, %v1534_v42  ;;  %v44_v42 = vld [vmem:[%s2043_s0 + $0x10] sm:$0xff] }
  0x18   :  { %1291 = vmatpush3.xpose.msk.msra.mxu1 %vm106_vm0, %v84_v43  ;;  %1248 = vmatprep.subr.msk.mxu0 %vm106_vm0, %v67_v50 }
  0x19   :  { %1292 = vmatprep.subr.msk.mxu1 %vm106_vm0, %v83_v51  ;;  %251 = vadd.xlane.f32.xlu1 %v250_v52  ;;  %v92_v52 = vmul.f32 %v44_v42, %v44_v42 }
  0x1a   :  { %203 = vadd.xlane.f32.xlu0 %v202_v54  ;;  %v48_v54 = vld [vmem:[%s2043_s0 + $0x30] sm:$0xff] }
  0x1b   :  { %1249 = vmatpush3.xpose.msk.msra.mxu0 %vm106_vm0, %v67_v50  ;;  %v96_v21 = vmul.f32 %v48_v54, %v48_v54 }
  0x1c   :  { %1293 = vmatpush3.xpose.msk.msra.mxu1 %vm106_vm0, %v83_v51  ;;  %1250 = vmatprep.subr.msk.mxu0 %vm106_vm0, %v66_v58  ;;  %v47_v51 = vld [vmem:[%s2043_s0 + $0x28] sm:$0xff] }
  0x1d   :  { %1294 = vmatprep.subr.msk.mxu1 %vm106_vm0, %v82_v59  ;;  %254 = vadd.xlane.f32.xlu1 %v253_v60  ;;  %v93_v60 = vmul.f32 %v45_v45, %v45_v45  ;;  %v95_v15 = vmul.f32 %v47_v51, %v47_v51 }
  0x1e   :  { %206 = vadd.xlane.f32.xlu0 %v205_v62 }
  0x1f   :  { %1251 = vmatpush3.xpose.msk.msra.mxu0 %vm106_vm0, %v66_v58  ;;  %v113_v58 = vsel %vm106_vm0, %v92_v52, 0.0 }
  0x20   :  { %1295 = vmatpush3.xpose.msk.msra.mxu1 %vm106_vm0, %v82_v59  ;;  %1252 = vmatprep.subr.msk.mxu0 %vm106_vm0, %v65_v57  ;;  %v49_v59 = vld [vmem:[%s2043_s0 + $0x38] sm:$0xff] }
  0x21   :  { %1296 = vmatprep.subr.msk.mxu1 %vm106_vm0, %v81_v56  ;;  %257 = vadd.xlane.f32.xlu1 %v256_v3  ;;  %v116_v3 = vsel %vm106_vm0, %v93_v60, 0.0  ;;  %v97_v29 = vmul.f32 %v49_v59, %v49_v59 }
  0x22   :  { %209 = vadd.xlane.f32.xlu0 %v208_v10  ;;  %v143_v10 = vsel %vm106_vm0, %v102_v63, 0.0 }
  0x23   :  { %1253 = vmatpush3.xpose.msk.msra.mxu0 %vm106_vm0, %v65_v57  ;;  %v101_v57 = vmul.f32 %v53_v46, %v53_v46  ;;  %v128_v37 = vsel %vm106_vm0, %v97_v29, 0.0 }
  0x24   :  { %1297 = vmatpush3.xpose.msk.msra.mxu1 %vm106_vm0, %v81_v56  ;;  %1254 = vmatprep.subr.msk.mxu0 %vm106_vm0, %v64_v49 }
  0x25   :  { %1298 = vmatprep.subr.msk.mxu1 %vm106_vm0, %v80_v48  ;;  %260 = vadd.xlane.f32.xlu1 %v259_v12  ;;  %v140_v62 = vsel %vm106_vm0, %v101_v57, 0.0 }
  0x26   :  { %212 = vadd.xlane.f32.xlu0 %v211_v18  ;;  %v146_v18 = vsel %vm106_vm0, %v103_v11, 0.0 }
  0x27   :  { %1255 = vmatpush3.xpose.msk.msra.mxu0 %vm106_vm0, %v64_v49 }
  0x28   :  { %1299 = vmatpush3.xpose.msk.msra.mxu1 %vm106_vm0, %v80_v48  ;;  %1256 = vmatprep.subr.msk.mxu0 %vm106_vm0, %v1529_v41 }
  0x29   :  { %1300 = vmatprep.subr.msk.mxu1 %vm106_vm0, %v1520_v40  ;;  %263 = vadd.xlane.f32.xlu1 %v262_v20  ;;  %v122_v20 = vsel %vm106_vm0, %v95_v15, 0.0 }
  0x2a   :  { %215 = vadd.xlane.f32.xlu0 %v214_v26  ;;  %v149_v26 = vsel %vm106_vm0, %v104_v19, 0.0 }
  0x2b   :  { %1257 = vmatpush3.xpose.msk.msra.mxu0 %vm106_vm0, %v1529_v41  ;;  %v51_v41 = vld [vmem:[%s2043_s0 + $0x48] sm:$0xff] }
  0x2c   :  { %1301 = vmatpush3.xpose.msk.msra.mxu1 %vm106_vm0, %v1520_v40  ;;  %1258 = vmatprep.subr.msk.mxu0 %vm106_vm0, %v1486_v32  ;;  %v43_v40 = vld [vmem:[%s2043_s0 + $0x8] sm:$0xff]  ;;  %v99_v43 = vmul.f32 %v51_v41, %v51_v41 }
  0x2d   :  { %1302 = vmatprep.subr.msk.mxu1 %vm106_vm0, %v1472_v30  ;;  %266 = vadd.xlane.f32.xlu1 %v265_v28  ;;  %v125_v28 = vsel %vm106_vm0, %v96_v21, 0.0 }
  0x2e   :  { %218 = vadd.xlane.f32.xlu0 %v217_v36  ;;  %v134_v48 = vsel %vm106_vm0, %v99_v43, 0.0  ;;  %v152_v36 = vsel %vm106_vm0, %v105_v27, 0.0 }
  0x2f   :  { %1259 = vmatpush3.xpose.msk.msra.mxu0 %vm106_vm0, %v1486_v32  ;;  %v184_v32 = vmul.f32 %v1423_v17, %v1423_v17 }
  0x30   :  { %1303 = vmatpush3.xpose.msk.msra.mxu1 %vm106_vm0, %v1472_v30  ;;  %1260 = vmatprep.subr.msk.mxu0 %vm106_vm0, %v1447_v23  ;;  %v168_v30 = vmul.f32 %v1418_v16, %v1418_v16 }
  0x31   :  { %1304 = vmatprep.subr.msk.mxu1 %vm106_vm0, %v1438_v22  ;;  %269 = vadd.xlane.f32.xlu1 %v268_v35  ;;  %v274_v17 = vsel %vm106_vm0, %v184_v32, 0.0  ;;  %v1326_v35 = vmov 3.4028235e+38  }
  0x32   :  { %221 = vadd.xlane.f32.xlu0 %v220_v34  ;;  %v226_v16 = vsel %vm106_vm0, %v168_v30, 0.0  ;;  %20 = vst [vmem:[#allocation2] sm:$0x1] %v1326_v35  ;;  %21 = vst [vmem:[#allocation2 + $0x1] sm:$0x1] %v1326_v35 }
  0x33   :  { %1261 = vmatpush3.xpose.msk.msra.mxu0 %vm106_vm0, %v1447_v23  ;;  %v185_v23 = vmul.f32 %v1377_v6, %v1377_v6  ;;  %27 = vst.msk [vmem:[#allocation3 + $0x8] sm:$0xff] %vm25_vm1, %v1326_v35  ;;  %26 = vst.msk [vmem:[#allocation3] sm:$0xff] %vm25_vm1, %v1326_v35 }
  0x34   :  { %1305 = vmatpush3.xpose.msk.msra.mxu1 %vm106_vm0, %v1438_v22  ;;  %1262 = vmatprep.subr.msk.mxu0 %vm106_vm0, %v1412_v14  ;;  %v169_v22 = vmul.f32 %v1372_v5, %v1372_v5  ;;  %28 = vst.msk [vmem:[#allocation3 + $0x10] sm:$0xff] %vm25_vm1, %v1326_v35  ;;  %29 = vst.msk [vmem:[#allocation3 + $0x18] sm:$0xff] %vm25_vm1, %v1326_v35 }
  0x35   :  { %1306 = vmatprep.subr.msk.mxu1 %vm106_vm0, %v1407_v13  ;;  %272 = vadd.xlane.f32.xlu1 %v271_v25  ;;  %v277_v6 = vsel %vm106_vm0, %v185_v23, 0.0  ;;  %30 = vst.msk [vmem:[#allocation3 + $0x20] sm:$0xff] %vm25_vm1, %v1326_v35  ;;  %31 = vst.msk [vmem:[#allocation3 + $0x28] sm:$0xff] %vm25_vm1, %v1326_v35 }
  0x36   :  { %224 = vadd.xlane.f32.xlu0 %v223_v24  ;;  %v229_v5 = vsel %vm106_vm0, %v169_v22, 0.0  ;;  %32 = vst.msk [vmem:[#allocation3 + $0x30] sm:$0xff] %vm25_vm1, %v1326_v35  ;;  %33 = vst.msk [vmem:[#allocation3 + $0x38] sm:$0xff] %vm25_vm1, %v1326_v35 }
  0x37   :  { %1263 = vmatpush3.xpose.msk.msra.mxu0 %vm106_vm0, %v1412_v14  ;;  %v186_v14 = vmul.f32 %v1351_v1, %v1351_v1  ;;  %34 = vst.msk [vmem:[#allocation3 + $0x40] sm:$0xff] %vm25_vm1, %v1326_v35  ;;  %35 = vst.msk [vmem:[#allocation3 + $0x48] sm:$0xff] %vm25_vm1, %v1326_v35 }
  0x38   :  { %1307 = vmatpush3.xpose.msk.msra.mxu1 %vm106_vm0, %v1407_v13  ;;  %1264 = vmatprep.subr.msk.mxu0 %vm106_vm0, %v1393_v9  ;;  %v170_v13 = vmul.f32 %v1346_v0, %v1346_v0  ;;  %36 = vst.msk [vmem:[#allocation3 + $0x50] sm:$0xff] %vm25_vm1, %v1326_v35  ;;  %37 = vst.msk [vmem:[#allocation3 + $0x58] sm:$0xff] %vm25_vm1, %v1326_v35 }
  0x39   :  { %1308 = vmatprep.subr.msk.mxu1 %vm106_vm0, %v1388_v8  ;;  %275 = vadd.xlane.f32.xlu1 %v274_v17  ;;  %v280_v1 = vsel %vm106_vm0, %v186_v14, 0.0  ;;  %38 = vst.msk [vmem:[#allocation3 + $0x60] sm:$0xff] %vm25_vm1, %v1326_v35  ;;  %39 = vst.msk [vmem:[#allocation3 + $0x68] sm:$0xff] %vm25_vm1, %v1326_v35 }
  0x3a   :  { %227 = vadd.xlane.f32.xlu0 %v226_v16  ;;  %v232_v0 = vsel %vm106_vm0, %v170_v13, 0.0  ;;  %40 = vst.msk [vmem:[#allocation3 + $0x70] sm:$0xff] %vm25_vm1, %v1326_v35  ;;  %41 = vst.msk [vmem:[#allocation3 + $0x78] sm:$0xff] %vm25_vm1, %v1326_v35 }
  0x3b   :  { %1265 = vmatpush3.xpose.msk.msra.mxu0 %vm106_vm0, %v1393_v9  ;;  %v90_v9 = vmul.f32 %v1477_v31, %v1477_v31  ;;  %v98_v31 = vmul.f32 %v1491_v33, %v1491_v33  ;;  %v46_v33 = vld [vmem:[%s2043_s0 + $0x20] sm:$0xff] }
  0x3c   :  { %1309 = vmatpush3.xpose.msk.msra.mxu1 %vm106_vm0, %v1388_v8  ;;  %1266 = vmatprep.subr.msk.mxu0 %vm106_vm0, %v1367_v4  ;;  %v91_v8 = vmul.f32 %v43_v40, %v43_v40  ;;  %v94_v7 = vmul.f32 %v46_v33, %v46_v33 }
  0x3d   :  { %1310 = vmatprep.subr.msk.mxu1 %vm106_vm0, %v1356_v2  ;;  %278 = vadd.xlane.f32.xlu1 %v277_v6  ;;  %v107_v44 = vsel %vm106_vm0, %v90_v9, 0.0  ;;  %v131_v50 = vsel %vm106_vm0, %v98_v31, 0.0 }
  0x3e   :  { %230 = vadd.xlane.f32.xlu0 %v229_v5  ;;  %v119_v12 = vsel %vm106_vm0, %v94_v7, 0.0 }
  0x3f   :  { %1267 = vmatpush3.xpose.msk.msra.mxu0 %vm106_vm0, %v1367_v4  ;;  %v52_v4 = vld [vmem:[%s2043_s0 + $0x50] sm:$0xff] }
  0x40   :  { %1311 = vmatpush3.xpose.msk.msra.mxu1 %vm106_vm0, %v1356_v2  ;;  %v110_v2 = vsel %vm106_vm0, %v91_v8, 0.0  ;;  %v100_v49 = vmul.f32 %v52_v4, %v52_v4 }
  0x41   :  { %281 = vadd.xlane.f32.xlu1 %v280_v1 }
  0x42   :  { %233 = vadd.xlane.f32.xlu0 %v232_v0  ;;  %1269 = vmatmul.mubr.msk.f32.vlgmr.msra.gmra.mxu0 %vm106_vm0, %v43_v40  ;;  %v137_v56 = vsel %vm106_vm0, %v100_v49, 0.0 }
  0x43   :  { %1313 = vmatmul.mubr.msk.f32.vlgmr.msra.gmra.mxu1 %vm106_vm0, %v51_v41  ;;  %1271 = vmatprep.mubr.msk.f32.mxu0 %vm106_vm0, %v44_v42 }
  0x44   :  { %1315 = vmatprep.mubr.msk.f32.mxu1 %vm106_vm0, %v52_v4 }
  0x45   :  { %111 = vadd.xlane.f32.xlu1 %v110_v2  ;;  %v669_v2 = vlaneseq }
  0x46   :  { %108 = vadd.xlane.f32.xlu0 %v107_v44  ;;  %1272 = vmatmul.mubr.msk.f32.gmra.mxu0 %vm106_vm0, %v45_v45 }
  0x47   :  { %1316 = vmatmul.mubr.msk.f32.gmra.mxu1 %vm106_vm0, %v53_v46  ;;  %1274 = vmatprep.mubr.msk.f32.mxu0 %vm106_vm0, %v46_v33  ;;  %v1845_v31 = vand.u32 127, %v669_v2  ;;  %v1851_v46 = vshrl.u32 %v669_v2, 7 }
  0x48   :  { %1318 = vmatprep.mubr.msk.f32.mxu1 %vm106_vm0, %v54_v47 }
  0x49   :  { %135 = vadd.xlane.f32.xlu1 %v134_v48  ;;  %v675_v33 = vadd.s32 4294967288, %v1845_v31  ;;  %v682_v47 = vadd.s32 4294967280, %v1845_v31  ;;  %v673_v49 = vsub.s32 %v1845_v31, %v1851_v46  ;;  %v689_v52 = vadd.s32 4294967272, %v1845_v31 }
  0x4a   :  { %132 = vadd.xlane.f32.xlu0 %v131_v50  ;;  %1275 = vmatmul.mubr.msk.f32.gmra.mxu0 %vm106_vm0, %v47_v51  ;;  %v703_v7 = vadd.s32 4294967256, %v1845_v31  ;;  %v710_v19 = vadd.s32 4294967248, %v1845_v31 }
  0x4b   :  { %1319 = vmatmul.mubr.msk.f32.gmra.mxu1 %vm106_vm0, %v55_v53  ;;  %1277 = vmatprep.mubr.msk.f32.mxu0 %vm106_vm0, %v48_v54  ;;  %v678_v50 = vsub.s32 %v675_v33, %v1851_v46  ;;  %v685_v53 = vsub.s32 %v682_v47, %v1851_v46  ;;  %v692_v60 = vsub.s32 %v689_v52, %v1851_v46 }
  0x4c   :  { %1321 = vmatprep.mubr.msk.f32.mxu1 %vm106_vm0, %v56_v55 }
  0x4d   :  { %138 = vadd.xlane.f32.xlu1 %v137_v56 }
  0x4e   :  { %114 = vadd.xlane.f32.xlu0 %v113_v58  ;;  %1278 = vmatmul.mubr.msk.f32.gmra.mxu0 %vm106_vm0, %v49_v59  ;;  %v696_v58 = vadd.s32 4294967264, %v1845_v31 }
  0x4f   :  { %1322 = vmatmul.mubr.msk.f32.gmra.mxu1 %vm106_vm0, %v57_v61  ;;  %vm778_vm0 = vcmask 1048512  }
  0x50   :  { %v699_v11 = vsub.s32 %v696_v58, %v1851_v46 }
  0x51   :  { %141 = vadd.xlane.f32.xlu1 %v140_v62 }
  0x52   :  { %117 = vadd.xlane.f32.xlu0 %v116_v3 }
  0x55   :  { %144 = vadd.xlane.f32.xlu1 %v143_v10 }
  0x56   :  { %120 = vadd.xlane.f32.xlu0 %v119_v12 }
  0x59   :  { %147 = vadd.xlane.f32.xlu1 %v146_v18 }
  0x5a   :  { %123 = vadd.xlane.f32.xlu0 %v122_v20 }
  0x5d   :  { %150 = vadd.xlane.f32.xlu1 %v149_v26  ;;  %v706_v26 = vsub.s32 %v703_v7, %v1851_v46 }
  0x5e   :  { %126 = vadd.xlane.f32.xlu0 %v125_v28 }
  0x61   :  { %153 = vadd.xlane.f32.xlu1 %v152_v36 }
  0x62   :  { %129 = vadd.xlane.f32.xlu0 %v128_v37  ;;  %v717_v37 = vadd.s32 4294967240, %v1845_v31 }
  0x8e   :  { %v1765_v38 = vpop.xlane.xlu1 %236 }
  0x8f   :  { %v1767_v34 = vpop.xlane.xlu0 %188  ;;  %v783_v56 = vrot.slane %v1765_v38, %v673_v49 }
  0x90   :  { %v674_v54 = vrot.slane %v1767_v34, %v673_v49  ;;  %v713_v34 = vsub.s32 %v710_v19, %v1851_v46 }
  0x92   :  { %v1769_v39 = vpop.xlane.xlu1 %239 }
  0x93   :  { %v1771_v25 = vpop.xlane.xlu0 %191  ;;  %v787_v57 = vrot.slane %v1769_v39, %v678_v50 }
  0x94   :  { %v679_v55 = vrot.slane %v1771_v25, %v678_v50 }
  0x95   :  { %v788_v10 = vsel %vm680_vm2, %v787_v57, %v783_v56 }
  0x96   :  { %v1773_v32 = vpop.xlane.xlu1 %242  ;;  %v681_v63 = vsel %vm680_vm2, %v679_v55, %v674_v54  ;;  %v738_v54 = vadd.s32 4294967216, %v1845_v31  ;;  %vm930_vm2 = vcmp.lt.s32.totalorder %v1845_v31, 48 }
  0x97   :  { %v1775_v24 = vpop.xlane.xlu0 %194  ;;  %v792_v3 = vrot.slane %v1773_v32, %v685_v53 }
  0x98   :  { %v686_v62 = vrot.slane %v1775_v24, %v685_v53  ;;  %v724_v24 = vadd.s32 4294967232, %v1845_v31 }
  0x99   :  { %v793_v21 = vsel %vm687_vm3, %v792_v3, %v788_v10  ;;  %v752_v10 = vadd.s32 4294967200, %v1845_v31 }
  0x9a   :  { %v1777_v30 = vpop.xlane.xlu1 %245  ;;  %v688_v15 = vsel %vm687_vm3, %v686_v62, %v681_v63  ;;  %vm1124_vm3 = vcmask 1040384  }
  0x9b   :  { %v1779_v17 = vpop.xlane.xlu0 %197  ;;  %v797_v18 = vrot.slane %v1777_v30, %v692_v60 }
  0x9c   :  { %v693_v12 = vrot.slane %v1779_v17, %v692_v60 }
  0x9d   :  { %v798_v38 = vsel %vm694_vm4, %v797_v18, %v793_v21 }
  0x9e   :  { %v1781_v23 = vpop.xlane.xlu1 %248  ;;  %v695_v29 = vsel %vm694_vm4, %v693_v12, %v688_v15  ;;  %vm17_vm4 = vcmask 0  }
  0x9f   :  { %v1783_v16 = vpop.xlane.xlu0 %200  ;;  %v802_v36 = vrot.slane %v1781_v23, %v699_v11 }
  0xa0   :  { %v700_v28 = vrot.slane %v1783_v16, %v699_v11  ;;  %v720_v16 = vsub.s32 %v717_v37, %v1851_v46 }
  0xa1   :  { %v803_v17 = vsel %vm701_vm5, %v802_v36, %v798_v38  ;;  %v766_v36 = vadd.s32 4294967184, %v1845_v31 }
  0xa2   :  { %v1785_v22 = vpop.xlane.xlu1 %251  ;;  %v702_v25 = vsel %vm701_vm5, %v700_v28, %v695_v29 }
  0xa3   :  { %v1787_v6 = vpop.xlane.xlu0 %203  ;;  %v807_v32 = vrot.slane %v1785_v22, %v706_v26  ;;  %v727_v22 = vsub.s32 %v724_v24, %v1851_v46  ;;  %v769_v24 = vsub.s32 %v766_v36, %v1851_v46 }
  0xa4   :  { %v707_v39 = vrot.slane %v1787_v6, %v706_v26  ;;  %v731_v6 = vadd.s32 4294967224, %v1845_v31  ;;  %v755_v26 = vsub.s32 %v752_v10, %v1851_v46 }
  0xa5   :  { %v808_v49 = vsel %vm708_vm6, %v807_v32, %v803_v17  ;;  %v773_v32 = vadd.s32 4294967176, %v1845_v31 }
  0xa6   :  { %v1789_v14 = vpop.xlane.xlu1 %254  ;;  %v709_v33 = vsel %vm708_vm6, %v707_v39, %v702_v25  ;;  %v734_v56 = vsub.s32 %v731_v6, %v1851_v46 }
  0xa7   :  { %v1791_v5 = vpop.xlane.xlu0 %206  ;;  %v812_v47 = vrot.slane %v1789_v14, %v713_v34 }
  0xa8   :  { %v714_v23 = vrot.slane %v1791_v5, %v713_v34 }
  0xa9   :  { %v813_v5 = vsel %vm715_vm7, %v812_v47, %v808_v49  ;;  %v776_v47 = vsub.s32 %v773_v32, %v1851_v46 }
  0xaa   :  { %v1793_v13 = vpop.xlane.xlu1 %257  ;;  %v716_v52 = vsel %vm715_vm7, %v714_v23, %v709_v33 }
  0xab   :  { %v1795_v40 = vpop.xlane.xlu0 %209  ;;  %v817_v53 = vrot.slane %v1793_v13, %v720_v16  ;;  %v741_v13 = vsub.s32 %v738_v54, %v1851_v46 }
  0xac   :  { %v721_v50 = vrot.slane %v1795_v40, %v720_v16  ;;  %v745_v40 = vadd.s32 4294967208, %v1845_v31 }
  0xad   :  { %v818_v62 = vsel %vm722_vm8, %v817_v53, %v813_v5 }
  0xae   :  { %v1829_v1 = vpop.xlane.xlu1 %260  ;;  %v723_v58 = vsel %vm722_vm8, %v721_v50, %v716_v52 }
  0xaf   :  { %v1831_v8 = vpop.xlane.xlu0 %212  ;;  %v822_v60 = vrot.slane %v1829_v1, %v727_v22 }
  0xb0   :  { %v728_v14 = vrot.slane %v1831_v8, %v727_v22  ;;  %v748_v8 = vsub.s32 %v745_v40, %v1851_v46 }
  0xb1   :  { %v823_v12 = vsel %vm729_vm9, %v822_v60, %v818_v62 }
  0xb2   :  { %v1833_v0 = vpop.xlane.xlu1 %263  ;;  %v730_v3 = vsel %vm729_vm9, %v728_v14, %v723_v58 }
  0xb3   :  { %v1835_v9 = vpop.xlane.xlu0 %215  ;;  %v827_v7 = vrot.slane %v1833_v0, %v734_v56 }
  0xb4   :  { %v735_v63 = vrot.slane %v1835_v9, %v734_v56  ;;  %v759_v9 = vadd.s32 4294967192, %v1845_v31 }
  0xb5   :  { %v828_v21 = vsel %vm736_vm10, %v827_v7, %v823_v12 }
  0xb6   :  { %v1837_v41 = vpop.xlane.xlu1 %266  ;;  %v737_v18 = vsel %vm736_vm10, %v735_v63, %v730_v3 }
  0xb7   :  { %v1839_v42 = vpop.xlane.xlu0 %218  ;;  %v832_v19 = vrot.slane %v1837_v41, %v741_v13 }
  0xb8   :  { %v742_v1 = vrot.slane %v1839_v42, %v741_v13  ;;  %v762_v42 = vsub.s32 %v759_v9, %v1851_v46  ;;  %v1946_v13 = vsel %vm930_vm2, 0.0, %v1326_v35 }
  0xb9   :  { %v833_v38 = vsel %vm743_vm11, %v832_v19, %v828_v21 }
  0xba   :  { %v1841_v4 = vpop.xlane.xlu1 %269  ;;  %v744_v28 = vsel %vm743_vm11, %v742_v1, %v737_v18 }
  0xbb   :  { %v1843_v43 = vpop.xlane.xlu0 %221  ;;  %v837_v29 = vrot.slane %v1841_v4, %v748_v8 }
  0xbc   :  { %v749_v0 = vrot.slane %v1843_v43, %v748_v8 }
  0xbd   :  { %v838_v43 = vsel %vm750_vm12, %v837_v29, %v833_v38 }
  0xbe   :  { %v1847_v44 = vpop.xlane.xlu1 %272  ;;  %v751_v39 = vsel %vm750_vm12, %v749_v0, %v744_v28 }
  0xbf   :  { %v1849_v45 = vpop.xlane.xlu0 %224  ;;  %v842_v25 = vrot.slane %v1847_v44, %v755_v26 }
  0xc0   :  { %v756_v41 = vrot.slane %v1849_v45, %v755_v26 }
  0xc1   :  { %v843_v33 = vsel %vm757_vm13, %v842_v25, %v838_v43 }
  0xc2   :  { %v1855_v48 = vpop.xlane.xlu1 %275  ;;  %v758_v17 = vsel %vm757_vm13, %v756_v41, %v751_v39 }
  0xc3   :  { %v1860_v51 = vpop.xlane.xlu0 %227  ;;  %v847_v16 = vrot.slane %v1855_v48, %v762_v42 }
  0xc4   :  { %v763_v4 = vrot.slane %v1860_v51, %v762_v42 }
  0xc5   :  { %v848_v22 = vsel %vm764_vm14, %v847_v16, %v843_v33 }
  0xc6   :  { %v1869_v59 = vpop.xlane.xlu1 %278  ;;  %v765_v49 = vsel %vm764_vm14, %v763_v4, %v758_v17 }
  0xc7   :  { %v1872_v61 = vpop.xlane.xlu0 %230  ;;  %v852_v44 = vrot.slane %v1869_v59, %v769_v24 }
  0xc8   :  { %v770_v6 = vrot.slane %v1872_v61, %v769_v24 }
  0xc9   :  { %v853_v48 = vsel %vm771_vm15, %v852_v44, %v848_v22 }
  0xca   :  { %v1881_v20 = vpop.xlane.xlu1 %281  ;;  %v772_v52 = vsel %vm771_vm15, %v770_v6, %v765_v49 }
  0xcb   :  { %v1884_v27 = vpop.xlane.xlu0 %233  ;;  %v857_v51 = vrot.slane %v1881_v20, %v776_v47 }
  0xcc   :  { %v777_v50 = vrot.slane %v1884_v27, %v776_v47 }
  0xcd   :  { %v858_v56 = vsel %vm778_vm0, %v857_v51, %v853_v48 }
  0xce   :  { %v1893_v30 = vpop.xlane.xlu1 %111  ;;  %v779_v5 = vsel %vm778_vm0, %v777_v50, %v772_v52 }
  0xcf   :  { %v1896_v2 = vpop.xlane.xlu0 %108  ;;  %v880_v61 = vadd.f32 %v779_v5, %v1893_v30 }
  0xd0   :  { %v879_v60 = vadd.f32 %v779_v5, %v1896_v2 }
  0xd2   :  { %v1905_v55 = vpop.xlane.xlu1 %135 }
  0xd3   :  { %v1908_v57 = vpop.xlane.xlu0 %132  ;;  %v888_v27 = vadd.f32 %v858_v56, %v1905_v55 }
  0xd4   :  { %v887_v63 = vadd.f32 %v858_v56, %v1908_v57 }
  0xd6   :  { %v139_v11 = vpop.xlane.xlu1 %138 }
  0xd7   :  { %v1918_v15 = vpop.xlane.xlu0 %114  ;;  %v889_v3 = vadd.f32 %v858_v56, %v139_v11 }
  0xd8   :  { %v881_v12 = vadd.f32 %v779_v5, %v1918_v15 }
  0xda   :  { %v142_v37 = vpop.xlane.xlu1 %141 }
  0xdb   :  { %v118_v34 = vpop.xlane.xlu0 %117  ;;  %v890_v8 = vadd.f32 %v858_v56, %v142_v37 }
  0xdc   :  { %v882_v18 = vadd.f32 %v779_v5, %v118_v34 }
  0xde   :  { %v145_v23 = vpop.xlane.xlu1 %144 }
  0xdf   :  { %v121_v45 = vpop.xlane.xlu0 %120  ;;  %v891_v35 = vadd.f32 %v858_v56, %v145_v23 }
  0xe0   :  { %v883_v29 = vadd.f32 %v779_v5, %v121_v45 }
  0xe2   :  { %v148_v53 = vpop.xlane.xlu1 %147 }
  0xe3   :  { %v124_v54 = vpop.xlane.xlu0 %123  ;;  %v892_v36 = vadd.f32 %v858_v56, %v148_v53 }
  0xe4   :  { %v884_v34 = vadd.f32 %v779_v5, %v124_v54 }
  0xe6   :  { %v151_v14 = vpop.xlane.xlu1 %150 }
  0xe7   :  { %v127_v40 = vpop.xlane.xlu0 %126  ;;  %v893_v24 = vadd.f32 %v858_v56, %v151_v14 }
  0xe8   :  { %v885_v33 = vadd.f32 %v779_v5, %v127_v40 }
  0xea   :  { %v154_v15 = vpop.xlane.xlu1 %153 }
  0xeb   :  { %v130_v41 = vpop.xlane.xlu0 %129  ;;  %v894_v44 = vadd.f32 %v858_v56, %v154_v15 }
  0xec   :  { %v886_v22 = vadd.f32 %v779_v5, %v130_v41 }
 0x102   :  { %v1270_v46 = vpop.f32.mrf.mxu0 }
 0x103   :  { %v896_v58 = vmul.f32 2.0, %v1270_v46  ;;  %v1314_v59 = vpop.f32.mrf.mxu1 }
 0x104   :  { %v904_v62 = vmul.f32 2.0, %v1314_v59  ;;  %v421_v20 = vpop.f32.mrf.mxu0 }
 0x105   :  { %v912_v7 = vsub.f32 %v880_v61, %v896_v58  ;;  %v895_v30 = vmul.f32 2.0, %v421_v20  ;;  %v598_v10 = vpop.f32.mrf.mxu1 }
 0x106   :  { %v920_v2 = vsub.f32 %v888_v27, %v904_v62  ;;  %v903_v1 = vmul.f32 2.0, %v598_v10  ;;  %v1273_v55 = vpop.f32.mrf.mxu0 }
 0x107   :  { %v911_v19 = vsub.f32 %v879_v60, %v895_v30  ;;  %v898_v9 = vmul.f32 2.0, %v1273_v55  ;;  %v1317_v21 = vpop.f32.mrf.mxu1  ;;  %v1951_v26 = vadd.f32 %v1946_v13, %v912_v7 }
 0x108   :  { %v919_v0 = vsub.f32 %v887_v63, %v903_v1  ;;  %v906_v57 = vmul.f32 2.0, %v1317_v21  ;;  %v431_v11 = vpop.f32.mrf.mxu0  ;;  %v941_v28 = vadd.f32 %v1946_v13, %v920_v2 }
 0x109   :  { %v897_v37 = vmul.f32 2.0, %v431_v11  ;;  %v608_v38 = vpop.f32.mrf.mxu1  ;;  %950 = vmin.xlane.f32.xlu1 %v1951_v26  ;;  %v932_v42 = vadd.f32 %v1946_v13, %v911_v19  ;;  %v914_v4 = vsub.f32 %v882_v18, %v898_v9 }
 0x10a   :  { %v922_v39 = vsub.f32 %v890_v8, %v906_v57  ;;  %v905_v25 = vmul.f32 2.0, %v608_v38  ;;  %v1276_v32 = vpop.f32.mrf.mxu0  ;;  %v940_v43 = vadd.f32 %v1946_v13, %v919_v0 }
 0x10b   :  { %v913_v17 = vsub.f32 %v881_v12, %v897_v37  ;;  %v900_v16 = vmul.f32 2.0, %v1276_v32  ;;  %v1320_v23 = vpop.f32.mrf.mxu1  ;;  %948 = vmin.xlane.f32.xlu0 %v932_v42  ;;  %v935_v60 = vadd.f32 %v1946_v13, %v914_v4 }
 0x10c   :  { %v921_v47 = vsub.f32 %v889_v3, %v905_v25  ;;  %v908_v45 = vmul.f32 2.0, %v1320_v23  ;;  %v441_v6 = vpop.f32.mrf.mxu0  ;;  %v943_v49 = vadd.f32 %v1946_v13, %v922_v39  ;;  %v1058_v23 = vld [vmem:[#allocation2 + $0x1] sm:$0x1] }
 0x10d   :  { %v916_v50 = vsub.f32 %v884_v34, %v900_v16  ;;  %v899_v52 = vmul.f32 2.0, %v441_v6  ;;  %v618_v51 = vpop.f32.mrf.mxu1  ;;  %966 = vmin.xlane.f32.xlu1 %v941_v28  ;;  %v934_v27 = vadd.f32 %v1946_v13, %v913_v17  ;;  %v1030_v18 = vmin.f32 %v1951_v26, %v935_v60  ;;  %v1057_v16 = vld [vmem:[#allocation2] sm:$0x1] }
 0x10e   :  { %v924_v53 = vsub.f32 %v892_v36, %v908_v45  ;;  %v907_v48 = vmul.f32 2.0, %v618_v51  ;;  %v1279_v54 = vpop.f32.mrf.mxu0  ;;  %v1043_v46 = vmin.f32 %v941_v28, %v943_v49  ;;  %v942_v61 = vadd.f32 %v1946_v13, %v921_v47  ;;  %v981_v51 = vld [vmem:[#allocation3 + $0x8] sm:$0xff] }
 0x10f   :  { %v915_v14 = vsub.f32 %v883_v29, %v899_v52  ;;  %v902_v58 = vmul.f32 2.0, %v1279_v54  ;;  %v1323_v59 = vpop.f32.mrf.mxu1  ;;  %964 = vmin.xlane.f32.xlu0 %v940_v43  ;;  %v937_v30 = vadd.f32 %v1946_v13, %v916_v50  ;;  %v1029_v19 = vmin.f32 %v932_v42, %v934_v27 }
 0x110   :  { %v923_v56 = vsub.f32 %v891_v35, %v907_v48  ;;  %v910_v5 = vmul.f32 2.0, %v1323_v59  ;;  %v451_v40 = vpop.f32.mrf.mxu0  ;;  %v1042_v62 = vmin.f32 %v940_v43, %v942_v61  ;;  %v945_v20 = vadd.f32 %v1946_v13, %v924_v53  ;;  %v980_v53 = vld [vmem:[#allocation3] sm:$0xff] }
 0x111   :  { %v918_v63 = vsub.f32 %v886_v22, %v902_v58  ;;  %v901_v3 = vmul.f32 2.0, %v451_v40  ;;  %v628_v7 = vpop.f32.mrf.mxu1  ;;  %970 = vmin.xlane.f32.xlu1 %v943_v49  ;;  %v936_v10 = vadd.f32 %v1946_v13, %v915_v14  ;;  %v1032_v57 = vmin.f32 %v1030_v18, %v937_v30  ;;  %v988_v58 = vld [vmem:[#allocation3 + $0x40] sm:$0xff]  ;;  %v983_v40 = vld [vmem:[#allocation3 + $0x18] sm:$0xff] }
 0x112   :  { %v926_v12 = vsub.f32 %v894_v44, %v910_v5  ;;  %v909_v8 = vmul.f32 2.0, %v628_v7  ;;  %v1045_v2 = vmin.f32 %v1043_v46, %v945_v20  ;;  %v944_v1 = vadd.f32 %v1946_v13, %v923_v56  ;;  %v989_v46 = vld [vmem:[#allocation3 + $0x48] sm:$0xff] }
 0x113   :  { %v917_v55 = vsub.f32 %v885_v33, %v901_v3  ;;  %954 = vmin.xlane.f32.xlu0 %v935_v60  ;;  %v939_v9 = vadd.f32 %v1946_v13, %v918_v63  ;;  %v1031_v11 = vmin.f32 %v1029_v19, %v936_v10  ;;  %v1327_v52 = vmov 0.0   ;;  %v990_v63 = vld [vmem:[#allocation3 + $0x50] sm:$0xff] }
 0x114   :  { %v925_v21 = vsub.f32 %v893_v24, %v909_v8  ;;  %v1044_v35 = vmin.f32 %v1042_v62, %v944_v1  ;;  %v947_v0 = vadd.f32 %v1946_v13, %v926_v12  ;;  %19 = vst.msk [vmem:[%s2044_s2 + $0x1] sm:$0x1] %vm17_vm4, %v1327_v52  ;;  %18 = vst.msk [vmem:[%s2044_s2] sm:$0x1] %vm17_vm4, %v1327_v52 }
 0x115   :  { %968 = vmin.xlane.f32.xlu1 %v942_v61  ;;  %v938_v28 = vadd.f32 %v1946_v13, %v917_v55  ;;  %v1034_v37 = vmin.f32 %v1032_v57, %v939_v9 }
 0x116   :  { %v946_v29 = vadd.f32 %v1946_v13, %v925_v21  ;;  %v1047_v36 = vmin.f32 %v1045_v2, %v947_v0  ;;  %v993_v2 = vld [vmem:[#allocation3 + $0x68] sm:$0xff] }
 0x117   :  { %952 = vmin.xlane.f32.xlu0 %v934_v27  ;;  %v1033_v15 = vmin.f32 %v1031_v11, %v938_v28  ;;  %v991_v27 = vld [vmem:[#allocation3 + $0x58] sm:$0xff] }
 0x118   :  { %v1046_v38 = vmin.f32 %v1044_v35, %v946_v29  ;;  %v985_v35 = vld [vmem:[#allocation3 + $0x28] sm:$0xff] }
 0x119   :  { %974 = vmin.xlane.f32.xlu1 %v945_v20  ;;  %v1035_v26 = vmin.f32 %v1033_v15, %v1034_v37  ;;  %v992_v15 = vld [vmem:[#allocation3 + $0x60] sm:$0xff] }
 0x11a   :  { %v1048_v42 = vmin.f32 %v1046_v38, %v1047_v36 }
 0x11b   :  { %958 = vmin.xlane.f32.xlu0 %v937_v30  ;;  %v1036_v34 = vrot.slane %v1035_v26, 4  ;;  %v982_v30 = vld [vmem:[#allocation3 + $0x10] sm:$0xff] }
 0x11c   :  { %v1049_v41 = vrot.slane %v1048_v42, 4 }
 0x11d   :  { %972 = vmin.xlane.f32.xlu1 %v944_v1  ;;  %v1037_v39 = vmin.f32 %v1035_v26, %v1036_v34 }
 0x11e   :  { %v1050_v25 = vmin.f32 %v1048_v42, %v1049_v41  ;;  %v984_v42 = vld [vmem:[#allocation3 + $0x20] sm:$0xff] }
 0x11f   :  { %956 = vmin.xlane.f32.xlu0 %v936_v10  ;;  %v1038_v32 = vrot.slane %v1037_v39, 2 }
 0x120   :  { %v1051_v43 = vrot.slane %v1050_v25, 2 }
 0x121   :  { %976 = vmin.xlane.f32.xlu1 %v946_v29  ;;  %v1039_v24 = vmin.f32 %v1037_v39, %v1038_v32  ;;  %v994_v32 = vld [vmem:[#allocation3 + $0x70] sm:$0xff] }
 0x122   :  { %v1052_v13 = vmin.f32 %v1050_v25, %v1051_v43 }
 0x123   :  { %960 = vmin.xlane.f32.xlu0 %v938_v28  ;;  %v1040_v4 = vrot.slane %v1039_v24, 1 }
 0x124   :  { %v1053_v17 = vrot.slane %v1052_v13, 1 }
 0x125   :  { %978 = vmin.xlane.f32.xlu1 %v947_v0  ;;  %v1041_v33 = vmin.f32 %v1039_v24, %v1040_v4 }
 0x126   :  { %v1054_v47 = vmin.f32 %v1052_v13, %v1053_v17 }
 0x127   :  { %962 = vmin.xlane.f32.xlu0 %v939_v9  ;;  %v1059_v45 = vmin.f32 %v1057_v16, %v1041_v33 }
 0x128   :  { %v1060_v6 = vmin.f32 %v1058_v23, %v1054_v47  ;;  %v986_v23 = vld [vmem:[#allocation3 + $0x30] sm:$0xff] }
 0x129   :  { %v1120_v49 = vsel %vm930_vm2, %v1059_v45, 0.0  ;;  %1061 = vst [vmem:[#allocation2] sm:$0x1] %v1059_v45 }
 0x12a   :  { %v1121_v44 = vsel %vm930_vm2, %v1060_v6, 0.0  ;;  %1062 = vst [vmem:[#allocation2 + $0x1] sm:$0x1] %v1060_v6  ;;  %v1125_v22 = vsel %vm1124_vm3, %v1120_v49, 0.0 }
 0x12b   :  { %v1128_v50 = vsel %vm1124_vm3, %v1121_v44, 0.0  ;;  %1126 = vadd.xlane.f32.xlu0 %v1125_v22  ;;  %v995_v22 = vld [vmem:[#allocation3 + $0x78] sm:$0xff] }
 0x12c   :  { %1129 = vadd.xlane.f32.xlu1 %v1128_v50 }
 0x192   :  { %v951_v31 = vpop.xlane.xlu1 %950 }
 0x193   :  { %v997_v48 = vmin.f32 %v981_v51, %v951_v31 }
 0x194   :  { %v949_v54 = vpop.xlane.xlu0 %948 }
 0x195   :  { %1014 = vst.msk [vmem:[#allocation3 + $0x8] sm:$0xff] %vm25_vm1, %v997_v48  ;;  %v996_v61 = vmin.f32 %v980_v53, %v949_v54  ;;  %v1069_v0 = vsel %vm25_vm1, %v997_v48, 0.0  ;;  %v987_v48 = vld [vmem:[#allocation3 + $0x38] sm:$0xff] }
 0x196   :  { %v967_v14 = vpop.xlane.xlu1 %966 }
 0x197   :  { %1013 = vst.msk [vmem:[#allocation3] sm:$0xff] %vm25_vm1, %v996_v61  ;;  %v1005_v59 = vmin.f32 %v989_v46, %v967_v14  ;;  %v1068_v1 = vsel %vm25_vm1, %v996_v61, 0.0 }
 0x198   :  { %v965_v60 = vpop.xlane.xlu0 %964  ;;  %v1070_v28 = vadd.f32 %v1069_v0, %v1068_v1 }
 0x199   :  { %1022 = vst.msk [vmem:[#allocation3 + $0x48] sm:$0xff] %vm25_vm1, %v1005_v59  ;;  %v1004_v56 = vmin.f32 %v988_v58, %v965_v60  ;;  %v1090_v55 = vsel %vm25_vm1, %v1005_v59, 0.0 }
 0x19a   :  { %v971_v5 = vpop.xlane.xlu1 %970 }
 0x19b   :  { %1021 = vst.msk [vmem:[#allocation3 + $0x40] sm:$0xff] %vm25_vm1, %v1004_v56  ;;  %v1007_v62 = vmin.f32 %v991_v27, %v971_v5  ;;  %v1089_v10 = vsel %vm25_vm1, %v1004_v56, 0.0 }
 0x19c   :  { %v955_v20 = vpop.xlane.xlu0 %954  ;;  %v1091_v9 = vadd.f32 %v1090_v55, %v1089_v10  ;;  %v1066_v55 = vld [vmem:[%s2044_s2] sm:$0x1] }
 0x19d   :  { %1024 = vst.msk [vmem:[#allocation3 + $0x58] sm:$0xff] %vm25_vm1, %v1007_v62  ;;  %v999_v3 = vmin.f32 %v983_v40, %v955_v20  ;;  %v1094_v34 = vsel %vm25_vm1, %v1007_v62, 0.0 }
 0x19e   :  { %v969_v7 = vpop.xlane.xlu1 %968 }
 0x19f   :  { %1016 = vst.msk [vmem:[#allocation3 + $0x18] sm:$0xff] %vm25_vm1, %v999_v3  ;;  %v1006_v12 = vmin.f32 %v990_v63, %v969_v7  ;;  %v1073_v43 = vsel %vm25_vm1, %v999_v3, 0.0 }
 0x1a0   :  { %v953_v8 = vpop.xlane.xlu0 %952 }
 0x1a1   :  { %1023 = vst.msk [vmem:[#allocation3 + $0x50] sm:$0xff] %vm25_vm1, %v1006_v12  ;;  %v1092_v18 = vsel %vm25_vm1, %v1006_v12, 0.0  ;;  %v998_v19 = vmin.f32 %v982_v30, %v953_v8  ;;  %v1067_v8 = vld [vmem:[%s2044_s2 + $0x1] sm:$0x1] }
 0x1a2   :  { %v975_v21 = vpop.xlane.xlu1 %974  ;;  %v1093_v29 = vadd.f32 %v1092_v18, %v1091_v9 }
 0x1a3   :  { %1015 = vst.msk [vmem:[#allocation3 + $0x10] sm:$0xff] %vm25_vm1, %v998_v19  ;;  %v1071_v57 = vsel %vm25_vm1, %v998_v19, 0.0  ;;  %v1009_v11 = vmin.f32 %v993_v2, %v975_v21 }
 0x1a4   :  { %v959_v36 = vpop.xlane.xlu0 %958  ;;  %v1072_v38 = vadd.f32 %v1071_v57, %v1070_v28  ;;  %v1095_v39 = vadd.f32 %v1094_v34, %v1093_v29 }
 0x1a5   :  { %1026 = vst.msk [vmem:[#allocation3 + $0x68] sm:$0xff] %vm25_vm1, %v1009_v11  ;;  %v1001_v37 = vmin.f32 %v985_v35, %v959_v36  ;;  %v1098_v33 = vsel %vm25_vm1, %v1009_v11, 0.0 }
 0x1a6   :  { %v973_v26 = vpop.xlane.xlu1 %972  ;;  %v1074_v17 = vadd.f32 %v1073_v43, %v1072_v38 }
 0x1a7   :  { %1018 = vst.msk [vmem:[#allocation3 + $0x28] sm:$0xff] %vm25_vm1, %v1001_v37  ;;  %v1008_v41 = vmin.f32 %v992_v15, %v973_v26  ;;  %v1077_v50 = vsel %vm25_vm1, %v1001_v37, 0.0 }
 0x1a8   :  { %v957_v25 = vpop.xlane.xlu0 %956 }
 0x1a9   :  { %1025 = vst.msk [vmem:[#allocation3 + $0x60] sm:$0xff] %vm25_vm1, %v1008_v41  ;;  %v1096_v24 = vsel %vm25_vm1, %v1008_v41, 0.0  ;;  %v1000_v13 = vmin.f32 %v984_v42, %v957_v25 }
 0x1aa   :  { %v1097_v4 = vadd.f32 %v1096_v24, %v1095_v39  ;;  %v977_v16 = vpop.xlane.xlu1 %976 }
 0x1ab   :  { %1017 = vst.msk [vmem:[#allocation3 + $0x20] sm:$0xff] %vm25_vm1, %v1000_v13  ;;  %v1075_v47 = vsel %vm25_vm1, %v1000_v13, 0.0  ;;  %v1010_v45 = vmin.f32 %v994_v32, %v977_v16 }
 0x1ac   :  { %v1076_v6 = vadd.f32 %v1075_v47, %v1074_v17  ;;  %v1099_v49 = vadd.f32 %v1098_v33, %v1097_v4  ;;  %v961_v44 = vpop.xlane.xlu0 %960 }
 0x1ad   :  { %1027 = vst.msk [vmem:[#allocation3 + $0x70] sm:$0xff] %vm25_vm1, %v1010_v45  ;;  %v1100_v52 = vsel %vm25_vm1, %v1010_v45, 0.0  ;;  %v1002_v51 = vmin.f32 %v986_v23, %v961_v44 }
 0x1ae   :  { %v1078_v31 = vadd.f32 %v1077_v50, %v1076_v6  ;;  %v979_v53 = vpop.xlane.xlu1 %978  ;;  %v1101_v61 = vadd.f32 %v1100_v52, %v1099_v49 }
 0x1af   :  { %1019 = vst.msk [vmem:[#allocation3 + $0x30] sm:$0xff] %vm25_vm1, %v1002_v51  ;;  %v1079_v54 = vsel %vm25_vm1, %v1002_v51, 0.0  ;;  %v1011_v46 = vmin.f32 %v995_v22, %v979_v53 }
 0x1b0   :  { %v963_v14 = vpop.xlane.xlu0 %962  ;;  %v1080_v60 = vadd.f32 %v1079_v54, %v1078_v31 }
 0x1b1   :  { %1028 = vst.msk [vmem:[#allocation3 + $0x78] sm:$0xff] %vm25_vm1, %v1011_v46  ;;  %v1102_v58 = vsel %vm25_vm1, %v1011_v46, 0.0  ;;  %v1003_v59 = vmin.f32 %v987_v48, %v963_v14 }
 0x1b2   :  { %v1103_v27 = vadd.f32 %v1102_v58, %v1101_v61 }
 0x1b3   :  { %1020 = vst.msk [vmem:[#allocation3 + $0x38] sm:$0xff] %vm25_vm1, %v1003_v59  ;;  %v1081_v56 = vsel %vm25_vm1, %v1003_v59, 0.0 }
 0x1b4   :  { %v1104_v5 = vrot.slane %v1103_v27, 4  ;;  %v1082_v40 = vadd.f32 %v1081_v56, %v1080_v60  ;;  %v1127_v11 = vpop.xlane.xlu0 %1126 }
 0x1b5   :  { %v1130_v21 = vpop.xlane.xlu1 %1129 }
 0x1b6   :  { %v1105_v62 = vadd.f32 %v1104_v5, %v1103_v27  ;;  %v1083_v20 = vrot.slane %v1082_v40, 4 }
 0x1b8   :  { %v1106_v63 = vrot.slane %v1105_v62, 2  ;;  %v1084_v3 = vadd.f32 %v1083_v20, %v1082_v40 }
 0x1ba   :  { %v1107_v7 = vadd.f32 %v1106_v63, %v1105_v62  ;;  %v1085_v30 = vrot.slane %v1084_v3, 2 }
 0x1bc   :  { %v1108_v10 = vrot.slane %v1107_v7, 1  ;;  %v1086_v12 = vadd.f32 %v1085_v30, %v1084_v3 }
 0x1be   :  { %v1109_v2 = vadd.f32 %v1108_v10, %v1107_v7  ;;  %v1087_v1 = vrot.slane %v1086_v12, 1 }
 0x1c0   :  { %v1111_v18 = vadd.f32 %v1109_v2, %v1067_v8  ;;  %v1088_v19 = vadd.f32 %v1087_v1, %v1086_v12 }
 0x1c2   :  { %1114 = vst.msk [vmem:[%s2044_s2 + $0x1] sm:$0x1] %vm17_vm4, %v1111_v18  ;;  %v1110_v9 = vadd.f32 %v1088_v19, %v1066_v55 }
 0x1c4   :  { %1113 = vst.msk [vmem:[%s2044_s2] sm:$0x1] %vm17_vm4, %v1110_v9 }
 0x1c9   :  { %v1123_v35 = vld [vmem:[%s2044_s2 + $0x1] sm:$0x1] }
 0x1ca   :  { %v1132_v0 = vadd.f32 %v1130_v21, %v1123_v35 }
 0x1cb   :  { %v1122_v57 = vld [vmem:[%s2044_s2] sm:$0x1] }
 0x1cc   :  { %1135 = vst.msk [vmem:[%s2044_s2 + $0x1] sm:$0x1] %vm17_vm4, %v1132_v0  ;;  %v1131_v28 = vadd.f32 %v1127_v11, %v1122_v57 }
 0x1ce   :  { %1134 = vst.msk [vmem:[%s2044_s2] sm:$0x1] %vm17_vm4, %v1131_v28 }

</bundles_post_ra>
